<compile_context>
chip_gen: v7x
topology: tpu7x:2x2x1
jax: 0.10.0
libtpu: 0.0.40
codegen_flags: <defaults>
</compile_context>

<pallas_src>
import math
from functools import partial

import jax
import jax.numpy as jnp
from jax.experimental import pallas as pl
from jax.experimental.pallas import tpu as pltpu


def _round_up(x, m):
    return ((x + m - 1) // m) * m


def stacked_gru_kernel(x_ref, h_ref, w_ref, b_ref, h1_ref, xh_ref):
    """One grid step = one (batch_tile, layer) pair.

    x_ref : (TB, P)         zero-padded external input (resident across the layer axis)
    h_ref : (1, TB, H)      this layer's incoming hidden state
    w_ref : (1, P+H, 4H)    fused gate weights, columns = [r | z | i_n | h_n]
    b_ref : (1, 1, 4H)      fused gate biases,  [b_ir+b_hr | b_iz+b_hz | b_in | b_hn]
    h1_ref: (1, TB, H)      this layer's new hidden state (output slab, indexed by layer)
    xh_ref: (TB, P+H)       VMEM scratch holding [layer_input | h] in the weight dtype,
                            carried across the layer axis
    """
    layer = pl.program_id(1)
    num_layers = pl.num_programs(1)
    TB, P = x_ref.shape
    H = h_ref.shape[-1]

    # First layer of each batch tile: stage the (padded) external input once.
    @pl.when(layer == 0)
    def _():
        xh_ref[:, :P] = x_ref[...].astype(xh_ref.dtype)

    h = h_ref[0].astype(jnp.float32)              # (TB, H), kept f32 for the blend
    xh_ref[:, P:] = h.astype(xh_ref.dtype)        # h-slot starts at lane-aligned offset P

    # Single fused MXU contraction for all gates; f32 accumulation.
    g = jnp.dot(xh_ref[...], w_ref[0], preferred_element_type=jnp.float32) + b_ref[0]

    r = jax.nn.sigmoid(g[:, 0:H])
    z = jax.nn.sigmoid(g[:, H:2 * H])
    n = jnp.tanh(g[:, 2 * H:3 * H] + r * g[:, 3 * H:4 * H])
    h_new = n + z * (h - n)                       # == (1 - z) * n + z * h

    h1_ref[0] = h_new.astype(h1_ref.dtype)

    # Feed this layer's output forward as the next layer's input.
    # TODO(synk): inter-layer nn.Dropout is treated as identity (eval mode only).
    if P > H:  # static: zero the padding tail once so padded weight rows see zeros
        @pl.when((layer == 0) & (layer + 1 < num_layers))
        def _():
            xh_ref[:, H:P] = jnp.zeros((TB, P - H), xh_ref.dtype)

    @pl.when(layer + 1 < num_layers)
    def _():
        xh_ref[:, :H] = h_new.astype(xh_ref.dtype)


def pack_params(params, input_size, rnn_size, param_dtype=jnp.bfloat16):
    """Pack per-layer GRUCell params into the fused [x|h] -> [r|z|i_n|h_n] layout.

    Returns (w_cat (L, P+H, 4H) in `param_dtype`, b_cat (L, 1, 4H) f32), with
    P = max(input_size, rnn_size) rounded up to a 128-lane multiple.
    """
    H = rnn_size
    L = len(params)
    P = _round_up(max(input_size, H), 128)
    w_cat = jnp.zeros((L, P + H, 4 * H), jnp.float32)
    b_cat = jnp.zeros((L, 1, 4 * H), jnp.float32)
    for l, (w_ih_t, w_hh_t, b_ih, b_hh) in enumerate(params):
        d_in = w_ih_t.shape[0]
        # input projection: r, z, i_n columns, rows [0:d_in] (rest stays zero-padded)
        w_cat = w_cat.at[l, :d_in, 0:3 * H].set(w_ih_t)
        # hidden projection: r, z columns share [0:2H]; h_n goes to its own slot [3H:4H]
        w_cat = w_cat.at[l, P:P + H, 0:2 * H].set(w_hh_t[:, 0:2 * H])
        w_cat = w_cat.at[l, P:P + H, 3 * H:4 * H].set(w_hh_t[:, 2 * H:3 * H])
        # biases: fold b_ih+b_hh for r/z; keep b_in and b_hn separate (b_hn is scaled by r)
        b_cat = b_cat.at[l, 0, 0:2 * H].set(b_ih[0, 0:2 * H] + b_hh[0, 0:2 * H])
        b_cat = b_cat.at[l, 0, 2 * H:3 * H].set(b_ih[0, 2 * H:3 * H])
        b_cat = b_cat.at[l, 0, 3 * H:4 * H].set(b_hh[0, 2 * H:3 * H])
    return w_cat.astype(param_dtype), b_cat


@partial(jax.jit, static_argnames=("batch_tile",))
def stacked_gru_forward(x, hidden, w_cat, b_cat, batch_tile=None):
    """x: (B, input_size); hidden: (num_layers, B, rnn_size) or None.
    Returns (output (B, rnn_size), h_1 (num_layers, B, rnn_size)); output == h_1[-1]."""
    B = x.shape[0]
    L, PH, G4 = w_cat.shape
    H = G4 // 4
    P = PH - H
    if hidden is None:
        hidden = jnp.zeros((L, B, H), x.dtype)
    # Zero-pad the external input up to the lane-aligned fused input width P.
    x_pad = jnp.pad(x, ((0, 0), (0, P - x.shape[1]))) if x.shape[1] < P else x

    # Batch tiling: whole batch when small; otherwise 256-row tiles (MXU-friendly).
    if batch_tile is None:
        batch_tile = B if (B <= 256 or B % 8 != 0) else 256
    TB = batch_tile if (B % batch_tile == 0) else B
    n_bt = B // TB

    # TODO(synk): input_output_aliases could alias `hidden` with the h_1 output to save
    # one HBM buffer; skipped to keep the caller's hidden array intact.
    h_1 = pl.pallas_call(
        stacked_gru_kernel,
        out_shape=jax.ShapeDtypeStruct((L, B, H), hidden.dtype),
        grid_spec=pltpu.PrefetchScalarGridSpec(
            num_scalar_prefetch=0,
            grid=(n_bt, L),
            in_specs=[
                pl.BlockSpec((TB, P), lambda b, l: (b, 0)),               # x (resident over layers)
                pl.BlockSpec((1, TB, H), lambda b, l: (l, b, 0)),         # hidden[l]
                pl.BlockSpec((1, P + H, 4 * H), lambda b, l: (l, 0, 0)),  # fused weights[l]
                pl.BlockSpec((1, 1, 4 * H), lambda b, l: (l, 0, 0)),      # fused biases[l]
            ],
            out_specs=pl.BlockSpec((1, TB, H), lambda b, l: (l, b, 0)),   # h_1[l]
            scratch_shapes=[pltpu.VMEM((TB, P + H), w_cat.dtype)],
        ),
        compiler_params=pltpu.CompilerParams(
            dimension_semantics=("parallel", "arbitrary")),
    )(x_pad, hidden, w_cat, b_cat)
    return h_1[-1], h_1


def init_params(key, num_layers, input_size, rnn_size):
    """Deterministic PyTorch-style GRUCell init: U(-1/sqrt(H), 1/sqrt(H)). f32, transposed layout."""
    params = []
    bound = 1.0 / math.sqrt(rnn_size)
    in_sz = input_size
    for _ in range(num_layers):
        key, k1, k2, k3, k4 = jax.random.split(key, 5)
        w_ih_t = jax.random.uniform(k1, (in_sz, 3 * rnn_size), jnp.float32, -bound, bound)
        w_hh_t = jax.random.uniform(k2, (rnn_size, 3 * rnn_size), jnp.float32, -bound, bound)
        b_ih = jax.random.uniform(k3, (1, 3 * rnn_size), jnp.float32, -bound, bound)
        b_hh = jax.random.uniform(k4, (1, 3 * rnn_size), jnp.float32, -bound, bound)
        params.append((w_ih_t, w_hh_t, b_ih, b_hh))
        in_sz = rnn_size
    return params


def reference_forward(x, hidden, params):
    """Plain-JAX reference for correctness check (mirrors nn.GRUCell math)."""
    h_1 = []
    inp = x
    for i, (w_ih_t, w_hh_t, b_ih, b_hh) in enumerate(params):
        h = hidden[i]
        gi = inp @ w_ih_t + b_ih
        gh = h @ w_hh_t + b_hh
        H = h.shape[-1]
        r = jax.nn.sigmoid(gi[:, :H] + gh[:, :H])
        z = jax.nn.sigmoid(gi[:, H:2 * H] + gh[:, H:2 * H])
        n = jnp.tanh(gi[:, 2 * H:] + r * gh[:, 2 * H:])
        h_new = (1.0 - z) * n + z * h
        inp = h_new
        h_1.append(h_new)
    return inp, jnp.stack(h_1)


if __name__ == "__main__":
    num_layers = 2
    input_size = 128   # lane-aligned; arbitrary sizes are zero-padded up to a 128 multiple
    rnn_size = 128     # H multiple of 128 -> aligned gate slices, unmasked stores
    batch = 8          # multiple of 8 sublanes

    key = jax.random.PRNGKey(0)
    key, kx, kh, kp = jax.random.split(key, 4)
    x = jax.random.normal(kx, (batch, input_size), jnp.float32)
    hidden = jax.random.normal(kh, (num_layers, batch, rnn_size), jnp.float32)
    params = init_params(kp, num_layers, input_size, rnn_size)

    # --- exact-semantics check: f32 weights vs plain-JAX reference ---
    w32, b32 = pack_params(params, input_size, rnn_size, param_dtype=jnp.float32)
    out32, h1_32 = stacked_gru_forward(x, hidden, w32, b32)
    out32 = jax.block_until_ready(out32)
    h1_32 = jax.block_until_ready(h1_32)
    out_ref, h1_ref = reference_forward(x, hidden, params)
    assert out32.shape == (batch, rnn_size)
    assert h1_32.shape == (num_layers, batch, rnn_size)
    assert jnp.allclose(out32, out_ref, atol=1e-4, rtol=1e-4)
    assert jnp.allclose(h1_32, h1_ref, atol=1e-4, rtol=1e-4)

    # --- fast path: bf16 weights (and bf16 MXU inputs), f32 accumulation/elementwise ---
    wbf, bbf = pack_params(params, input_size, rnn_size, param_dtype=jnp.bfloat16)
    outbf, h1_bf = stacked_gru_forward(x, hidden, wbf, bbf)
    outbf = jax.block_until_ready(outbf)
    h1_bf = jax.block_until_ready(h1_bf)
    params_bf = [(w_ih.astype(jnp.bfloat16).astype(jnp.float32),
                  w_hh.astype(jnp.bfloat16).astype(jnp.float32), b_ih, b_hh)
                 for (w_ih, w_hh, b_ih, b_hh) in params]
    out_ref_bf, h1_ref_bf = reference_forward(x, hidden, params_bf)
    assert jnp.allclose(outbf, out_ref_bf, atol=5e-2, rtol=5e-2)
    assert jnp.allclose(h1_bf, h1_ref_bf, atol=5e-2, rtol=5e-2)

    print("KERNEL_OK")
</pallas_src>

<mosaic_0001>
module attributes {stable_mosaic.version = 11 : i64} {
  func.func @stacked_gru_kernel(%arg0: i32, %arg1: i32, %arg2: memref<8x128xf32, #tpu.memory_space<vmem>>, %arg3: memref<1x8x128xf32, #tpu.memory_space<vmem>>, %arg4: memref<1x256x512xf32, #tpu.memory_space<vmem>>, %arg5: memref<1x1x512xf32, #tpu.memory_space<vmem>>, %arg6: memref<1x8x128xf32, #tpu.memory_space<vmem>>, %arg7: memref<8x256xf32, #tpu.memory_space<vmem>>) attributes {dimension_semantics = [#tpu.dimension_semantics<parallel>, #tpu.dimension_semantics<arbitrary>], iteration_bounds = array<i64: 1, 2>, scalar_prefetch = 0 : i64, scratch_operands = 1 : i64, tpu.core_type = #tpu.core_type<tc>, window_params = [{transform_indices = @transform_0, window_bounds = array<i64: 8, 128>}, {transform_indices = @transform_1, window_bounds = array<i64: 1, 8, 128>}, {transform_indices = @transform_2, window_bounds = array<i64: 1, 256, 512>}, {transform_indices = @transform_3, window_bounds = array<i64: 1, 1, 512>}, {transform_indices = @transform_4, window_bounds = array<i64: 1, 8, 128>}]} {
    %c0_i32 = arith.constant 0 : i32
    %0 = arith.cmpi eq, %arg1, %c0_i32 : i32
    %1 = arith.extui %0 : i1 to i32
    %c0_i32_0 = arith.constant 0 : i32
    %2 = arith.cmpi ne, %1, %c0_i32_0 : i32
    scf.if %2 {
      %c0_18 = arith.constant 0 : index
      %c0_19 = arith.constant 0 : index
      %41 = vector.load %arg2[%c0_18, %c0_19] : memref<8x128xf32, #tpu.memory_space<vmem>>, vector<8x128xf32>
      %c0_20 = arith.constant 0 : index
      %c0_21 = arith.constant 0 : index
      %42 = vector.load %arg7[%c0_20, %c0_21] : memref<8x256xf32, #tpu.memory_space<vmem>>, vector<8x128xf32>
      tpu.vector_store %arg7[%c0_20, %c0_21], %41 {strides = array<i32>} : memref<8x256xf32, #tpu.memory_space<vmem>>, vector<8x128xf32>,
    } else {
    }
    %c0 = arith.constant 0 : index
    %c0_1 = arith.constant 0 : index
    %c0_2 = arith.constant 0 : index
    %3 = vector.load %arg3[%c0, %c0_1, %c0_2] : memref<1x8x128xf32, #tpu.memory_space<vmem>>, vector<1x8x128xf32>
    %4 = vector.shape_cast %3 : vector<1x8x128xf32> to vector<8x128xf32>
    %c0_3 = arith.constant 0 : index
    %c128 = arith.constant 128 : index
    %5 = vector.load %arg7[%c0_3, %c128] : memref<8x256xf32, #tpu.memory_space<vmem>>, vector<8x128xf32>
    tpu.vector_store %arg7[%c0_3, %c128], %4 {strides = array<i32>} : memref<8x256xf32, #tpu.memory_space<vmem>>, vector<8x128xf32>,
    %c0_4 = arith.constant 0 : index
    %c0_5 = arith.constant 0 : index
    %6 = vector.load %arg7[%c0_4, %c0_5] : memref<8x256xf32, #tpu.memory_space<vmem>>, vector<8x256xf32>
    %c0_6 = arith.constant 0 : index
    %c0_7 = arith.constant 0 : index
    %c0_8 = arith.constant 0 : index
    %7 = vector.load %arg4[%c0_6, %c0_7, %c0_8] : memref<1x256x512xf32, #tpu.memory_space<vmem>>, vector<1x256x512xf32>
    %8 = vector.shape_cast %7 : vector<1x256x512xf32> to vector<256x512xf32>
    %cst = arith.constant dense<0.000000e+00> : vector<8x512xf32>
    %9 = tpu.matmul %6, %8, %cst {dimension_numbers = #tpu.dot_dimension_numbers<[1], [0], [0], [1], [0, 0, 1, 1], [], []>} : vector<8x256xf32>, vector<256x512xf32>, vector<8x512xf32> -> vector<8x512xf32>
    %c0_9 = arith.constant 0 : index
    %c0_10 = arith.constant 0 : index
    %c0_11 = arith.constant 0 : index
    %10 = vector.load %arg5[%c0_9, %c0_10, %c0_11] : memref<1x1x512xf32, #tpu.memory_space<vmem>>, vector<1x1x512xf32>
    %11 = vector.shape_cast %10 : vector<1x1x512xf32> to vector<1x512xf32>
    %12 = vector.broadcast %11 : vector<1x512xf32> to vector<8x512xf32>
    %13 = arith.addf %9, %12 : vector<8x512xf32>
    %14 = vector.extract_strided_slice %13 {offsets = [0, 0], sizes = [8, 128], strides = [1, 1]} : vector<8x512xf32> to vector<8x128xf32>
    %15 = arith.negf %14 : vector<8x128xf32>
    %16 = math.exp %15 : vector<8x128xf32>
    %cst_12 = arith.constant 1.000000e+00 : f32
    %17 = vector.broadcast %cst_12 : f32 to vector<8x128xf32>
    %18 = arith.addf %17, %16 : vector<8x128xf32>
    %19 = arith.divf %17, %18 : vector<8x128xf32>
    %20 = vector.extract_strided_slice %13 {offsets = [0, 128], sizes = [8, 128], strides = [1, 1]} : vector<8x512xf32> to vector<8x128xf32>
    %21 = arith.negf %20 : vector<8x128xf32>
    %22 = math.exp %21 : vector<8x128xf32>
    %cst_13 = arith.constant 1.000000e+00 : f32
    %23 = vector.broadcast %cst_13 : f32 to vector<8x128xf32>
    %24 = arith.addf %23, %22 : vector<8x128xf32>
    %25 = arith.divf %23, %24 : vector<8x128xf32>
    %26 = vector.extract_strided_slice %13 {offsets = [0, 256], sizes = [8, 128], strides = [1, 1]} : vector<8x512xf32> to vector<8x128xf32>
    %27 = vector.extract_strided_slice %13 {offsets = [0, 384], sizes = [8, 128], strides = [1, 1]} : vector<8x512xf32> to vector<8x128xf32>
    %28 = arith.mulf %19, %27 : vector<8x128xf32>
    %29 = arith.addf %26, %28 : vector<8x128xf32>
    %30 = math.tanh %29 : vector<8x128xf32>
    %31 = arith.subf %4, %30 : vector<8x128xf32>
    %32 = arith.mulf %25, %31 : vector<8x128xf32>
    %33 = arith.addf %30, %32 : vector<8x128xf32>
    %c0_14 = arith.constant 0 : index
    %c0_15 = arith.constant 0 : index
    %c0_16 = arith.constant 0 : index
    %34 = vector.load %arg6[%c0_14, %c0_15, %c0_16] : memref<1x8x128xf32, #tpu.memory_space<vmem>>, vector<1x8x128xf32>
    %35 = vector.shape_cast %34 : vector<1x8x128xf32> to vector<8x128xf32>
    %36 = vector.shape_cast %33 : vector<8x128xf32> to vector<1x8x128xf32>
    tpu.vector_store %arg6[%c0_14, %c0_15, %c0_16], %36 {strides = array<i32>} : memref<1x8x128xf32, #tpu.memory_space<vmem>>, vector<1x8x128xf32>,
    %c1_i32 = arith.constant 1 : i32
    %37 = arith.addi %arg1, %c1_i32 : i32
    %c2_i32 = arith.constant 2 : i32
    %38 = arith.cmpi slt, %37, %c2_i32 : i32
    %39 = arith.extui %38 : i1 to i32
    %c0_i32_17 = arith.constant 0 : i32
    %40 = arith.cmpi ne, %39, %c0_i32_17 : i32
    scf.if %40 {
      %c0_18 = arith.constant 0 : index
      %c0_19 = arith.constant 0 : index
      %41 = vector.load %arg7[%c0_18, %c0_19] : memref<8x256xf32, #tpu.memory_space<vmem>>, vector<8x128xf32>
      tpu.vector_store %arg7[%c0_18, %c0_19], %33 {strides = array<i32>} : memref<8x256xf32, #tpu.memory_space<vmem>>, vector<8x128xf32>,
    } else {
    }
    return
  }
  func.func @transform_0(%arg0: i32, %arg1: i32) -> (i32, i32) {
    %c0_i32 = arith.constant 0 : i32
    %c0_i32_0 = arith.constant 0 : i32
    return %arg0, %c0_i32 : i32, i32
  }
  func.func @transform_1(%arg0: i32, %arg1: i32) -> (i32, i32, i32) {
    %c0_i32 = arith.constant 0 : i32
    %c0_i32_0 = arith.constant 0 : i32
    return %arg1, %arg0, %c0_i32 : i32, i32, i32
  }
  func.func @transform_2(%arg0: i32, %arg1: i32) -> (i32, i32, i32) {
    %c0_i32 = arith.constant 0 : i32
    %c0_i32_0 = arith.constant 0 : i32
    %c0_i32_1 = arith.constant 0 : i32
    return %arg1, %c0_i32, %c0_i32_0 : i32, i32, i32
  }
  func.func @transform_3(%arg0: i32, %arg1: i32) -> (i32, i32, i32) {
    %c0_i32 = arith.constant 0 : i32
    %c0_i32_0 = arith.constant 0 : i32
    %c0_i32_1 = arith.constant 0 : i32
    return %arg1, %c0_i32, %c0_i32_0 : i32, i32, i32
  }
  func.func @transform_4(%arg0: i32, %arg1: i32) -> (i32, i32, i32) {
    %c0_i32 = arith.constant 0 : i32
    %c0_i32_0 = arith.constant 0 : i32
    return %arg1, %arg0, %c0_i32 : i32, i32, i32
  }
}

</mosaic_0001>

<bundles_post_ra>
// kernel: stacked_gru_forward.1
= control target key start
LH: loop header
LB: loop body
LE: loop exit
PB: predicated region body
PF: predicated region fallthrough
CT: control target
= control target key end

     0   :  { %9 = vsyncpa [#allocation4], 0  ;;  %s1536_s0 = inlined_call_operand.hbm [shape: f32[8,128], index: 0, kind: input, shape index: {}]   ;;  %s1537_s1 = inlined_call_operand.hbm [shape: f32[2,8,128], index: 1, kind: input, shape index: {}]   ;;  %s1538_s2 = inlined_call_operand.hbm [shape: f32[2,256,512], index: 2, kind: input, shape index: {}]   ;;  %s1539_s3 = inlined_call_operand.vmem [shape: f32[2,1,512], index: 3, kind: input, shape index: {}]   ;;  %s1540_s4 = inlined_call_operand.vmem [shape: f32[2,8,128], index: 4, kind: output, shape index: {}]  }
   0x1   :  { %10 = vsyncpa [#allocation6], 0 }
   0x2   :  { %12 = vsyncpa [#allocation6 + $0x1], 0  ;;  %s1175_s15 = smov 0   ;;  %s1177_s16 = smov 0  }
   0x3   :  { %s1179_s17 = smov 0   ;;  %s1181_s18 = smov 0  }
   0x4   :  { %s1183_s19 = smov 0   ;;  %s1185_s20 = smov 0  }
   0x5 LB: > { %s27_s21 = sadd.s32 1, %s1139_s19  ;;  %s65_s22 = sadd.s32 1, %s1131_s17  ;;  %s1143_s20 = sphi %s1185_s20, %s18_s20   ;;  %s1139_s19 = sphi %s1183_s19, %s1559_s19   ;;  %s1135_s18 = sphi %s1181_s18, %s1558_s18   ;;  %s1131_s17 = sphi %s1179_s17, %s1557_s17   ;;  %s1127_s16 = sphi %s1177_s16, %s1556_s16   ;;  %s1123_s15 = sphi %s1175_s15, %s1555_s15  }
   0x6   : > { %p28_p0 = scmp.ge.s32.totalorder %s27_s21, 2  ;;  %p72_p1 = scmp.ne.s32.totalorder %s1131_s17, %s1127_s16 }
   0x7   : > { %p73_p2 = scmp.eq.s32.totalorder %s1143_s20, 0  ;;  %p938_p4 = scmp.lt.s32.totalorder %s1143_s20, 2 }
   0x8   : > { %s1561_s21 = smov (%p28_p0, %s27_s21), 0  ;;  %s195_s24 = sand.u32 1, %s1143_s20  }
   0x9   : > { %p74_p3 = por %p73_p2, %p72_p1  ;;  %s60_s23 = ssub.s32 %s1139_s19, %s1561_s21 }
   0xa   : > { %p63_p5 = scmp.eq.s32.totalorder %s60_s23, 0  ;;  %s197_s25 = sand.u32 1, %s1131_s17  }
   0xb   : > { %s773_s26 = sshll.u32 %s1139_s19, 7  ;;  %s772_s28 = sshll.u32 %s197_s25, 3 }
   0xc   : > { %s1219_s27 = scalar_select %p63_p5, %s1131_s17, %s65_s22  }
   0xd   : > { %s1224_s5 = scalar_lea.hbm %s1537_s1, %s773_s26  ;;  %p1226_p6 = pnand %p938_p4, %p74_p3 }
   0xe   : > { %s199_s7 = scalar_lea.vmem [#allocation5], %s772_s28  ;;  %s1230_s9 = sshll.u32 %s197_s25, 10 }
   0xf   : > { %s207_s8 = sshll.u32 %s199_s7, 4  ;;  %s1234_s10 = scalar_lea.sflag [#allocation6], %s195_s24  ;;  %s1232_s8 = int_to_ptr.vmem [resolvable:$true] %s207_s8 }
  0x10   : > { %s1001_s11 = scalar_lea.hbm %s1224_s5, 128  ;;  %p1003_p8 = pneg %p1226_p6 }
  0x11   : > { %p1002_p7 = scmp.ne.s32.totalorder %s1224_s5, %s1001_s11  ;;  %s1006_s14 = scalar_lea.hbm %s1537_s1, 256 }
  0x12   : > { %p1007_p11 = scmp.lt.u32.totalorder %s1224_s5, %s1537_s1  ;;  %p1008_p12 = scmp.lt.u32.totalorder %s1006_s14, %s1001_s11 }
  0x13   : > { %p1004_p9 = pnand %p1003_p8, %p1002_p7  ;;  %p1010_p0 = scmp.lt.u32.totalorder %s1001_s11, %s1224_s5 }
  0x14   : > { %p1009_p13 = por %p1008_p12, %p1007_p11 }
  0x15   : > { %p1005_p10 = pneg %p1004_p9 }
  0x16   : > { %p1011_p1 = por %p1010_p0, %p1009_p13 }
  0x18   : > { %p1012_p2 = pnand %p1011_p1, %p1005_p10 }
  0x1a   : > { %1015 = shalt.err (!%p1012_p2)
}
  0x1b   : > { %s1016_s24 = scalar_lea.vmem %s1232_s8, 128  ;;  %s1145_s25 = smov [#allocation5]  }
  0x1c   : > { %p1017_p3 = scmp.ne.s32.totalorder %s1232_s8, %s1016_s24  ;;  %s1021_s26 = sshll.u32 %s1145_s25, 4  ;;  %s1022_s26 = int_to_ptr.vmem [resolvable:$false] %s1021_s26 }
  0x1d   : > { %s1023_s28 = scalar_lea.vmem %s1022_s26, 256  ;;  %p1024_p7 = scmp.lt.s32.totalorder %s1232_s8, %s1022_s26 }
  0x1e   : > { %p1019_p4 = pnand %p1017_p3, %p1003_p8  ;;  %p1025_p9 = scmp.lt.s32.totalorder %s1023_s28, %s1016_s24 }
  0x20   : > { %p1020_p5 = pneg %p1019_p4  ;;  %p1026_p11 = por %p1025_p9, %p1024_p7 }
  0x22   : > { %p1027_p12 = pnand %p1026_p11, %p1020_p5 }
  0x24   : > { %1030 = shalt.err (!%p1027_p12)
}
  0x25   : > { %933 = dma.hbm_to_vmem [thread:$0]  (!%p1226_p6), %s1224_s5, 128, %s1232_s8, %s1234_s10  }
  0x26   : > { %s789_s29 = sshll.u32 %s1139_s19, 14  ;;  %s218_s30 = scalar_lea.vmem [#allocation7], %s1230_s9 }
  0x27   : > { %s225_s7 = sshll.u32 %s218_s30, 4  ;;  %s1545_s11 = sadd.s32 4294967295, %s1143_s20   ;;  %s1281_s7 = int_to_ptr.vmem [resolvable:$true] %s225_s7 }
  0x28   : > { %p78_p10 = scmp.ne.s32.totalorder %s1127_s16, %s1123_s15  ;;  %p1269_p13 = scmp.eq.s32.totalorder %s1545_s11, 0 }
  0x29   : > { %p769_p0 = scmp.ge.s32.totalorder %s1143_s20, 1  ;;  %p169_p1 = scmp.lt.s32.totalorder %s1143_s20, 3 }
  0x2a   : > { %s1547_s12 = scalar_select %p1269_p13, 1, 0 }
  0x2b   : > { %p1277_p2 = por %p1269_p13, %p78_p10  ;;  %p1283_p3 = pnand %p769_p0, %p169_p1 }
  0x2c   : > { %s1146_s15 = smov [#allocation3]   ;;  %s1290_s22 = scalar_lea.hbm %s1538_s2, %s789_s29 }
  0x2d   : > { %s1548_s13 = scalar_select %p1277_p2, 1, 0 }
  0x2e   : > { %s1549_s5 = scalar_select %p1283_p3, 1, 0 }
  0x2f   : > { %s184_s8 = sshll.u32 %s1146_s15, 4  ;;  %p926_p4 = pneg %p1283_p3  ;;  %s1294_s8 = int_to_ptr.vmem [resolvable:$true] %s184_s8 }
  0x30   : > { %s1031_s24 = scalar_lea.hbm %s1290_s22, 16384  ;;  %s1036_s28 = scalar_lea.hbm %s1538_s2, 32768 }
  0x31   : > { %p1298_p5 = pnand %p926_p4, %p1269_p13  ;;  %p1032_p7 = scmp.ne.s32.totalorder %s1290_s22, %s1031_s24 }
  0x32   : > { %p1037_p12 = scmp.lt.u32.totalorder %s1290_s22, %s1538_s2  ;;  %p1038_p10 = scmp.lt.u32.totalorder %s1036_s28, %s1031_s24 }
  0x33   : > { %p1034_p9 = pnand %p1032_p7, %p1003_p8  ;;  %p1040_p1 = scmp.lt.u32.totalorder %s1031_s24, %s1290_s22 }
  0x34   : > { %p1039_p0 = por %p1038_p10, %p1037_p12 }
  0x35   : > { %p1035_p11 = pneg %p1034_p9 }
  0x36   : > { %p1041_p4 = por %p1040_p1, %p1039_p0 }
  0x38   : > { %p1042_p2 = pnand %p1041_p4, %p1035_p11 }
  0x3a   : > { %1045 = shalt.err (!%p1042_p2)
}
  0x3b   : > { %s1046_s15 = scalar_lea.vmem %s1281_s7, 16384  ;;  %s1147_s9 = smov [#allocation7]  }
  0x3c   : > { %p1047_p7 = scmp.ne.s32.totalorder %s1281_s7, %s1046_s15  ;;  %s1051_s14 = sshll.u32 %s1147_s9, 4  ;;  %s1052_s14 = int_to_ptr.vmem [resolvable:$false] %s1051_s14 }
  0x3d   : > { %s1053_s25 = scalar_lea.vmem %s1052_s14, 32768  ;;  %p1054_p3 = scmp.lt.s32.totalorder %s1281_s7, %s1052_s14 }
  0x3e   : > { %p1049_p9 = pnand %p1047_p7, %p1003_p8  ;;  %p1055_p12 = scmp.lt.s32.totalorder %s1053_s25, %s1046_s15 }
  0x40   : > { %p1050_p13 = pneg %p1049_p9  ;;  %p1056_p10 = por %p1055_p12, %p1054_p3 }
  0x42   : > { %p1057_p0 = pnand %p1056_p10, %p1050_p13 }
  0x44   : > { %1060 = shalt.err (!%p1057_p0)
}
  0x45   : > { %s1148_s24 = smov 512   ;;  %s1149_s26 = smov 32  }
  0x46   : > { %936 = dma.hbm_to_vmem [thread:$0]  (!%p1226_p6), %s1290_s22, 16384, %s1281_s7, %s1234_s10, %s1148_s24, %s1148_s24, %s1149_s26  }
  0x47   : > { %s1061_s30 = scalar_lea.hbm %s1536_s0, 128  ;;  %p1063_p13 = pneg %p1298_p5 }
  0x48   : > { %p1062_p8 = scmp.ne.s32.totalorder %s1536_s0, %s1061_s30  ;;  %p1068_p11 = scmp.lt.u32.totalorder %s1061_s30, %s1536_s0 }
  0x4a   : > { %p1064_p2 = pnand %p1063_p13, %p1062_p8 }
  0x4c   : > { %p1065_p3 = pneg %p1064_p2 }
  0x4e   : > { %p1070_p1 = pnand %p1068_p11, %p1065_p3 }
  0x50   : > { %1073 = shalt.err (!%p1070_p1)
}
  0x51   : > { %s1074_s6 = scalar_lea.vmem %s1294_s8, 128  ;;  %p1082_p9 = scmp.lt.s32.totalorder %s1294_s8, %s1294_s8 }
  0x52   : > { %p1075_p6 = scmp.ne.s32.totalorder %s1294_s8, %s1074_s6  ;;  %p1083_p12 = scmp.lt.s32.totalorder %s1074_s6, %s1074_s6 }
  0x54   : > { %p1077_p4 = pnand %p1075_p6, %p1063_p13  ;;  %p1084_p10 = por %p1083_p12, %p1082_p9 }
  0x56   : > { %p1078_p7 = pneg %p1077_p4 }
  0x58   : > { %p1085_p0 = pnand %p1084_p10, %p1078_p7 }
  0x5a   : > { %1088 = shalt.err (!%p1085_p0)
}
  0x5b   : > { %929 = dma.hbm_to_vmem [thread:$0]  (!%p1298_p5), %s1536_s0, 128, %s1294_s8, [#allocation4]  }
  0x5c   : > { %p1551_p8 = scmp.ne.s32.totalorder %s1549_s5, 0 }
  0x5d   : > { %p1552_p2 = scmp.ne.s32.totalorder (!%p1551_p8), %s1547_s12, 0 }
  0x5e   : > { %244 = sbr.rel (%p1551_p8) target bundleno = 448 (0x1c0), region = 36 }
  0x65   : > { %1114 = dma.done.wait (%p1552_p2), [#allocation4], 128  }
  0x66   : > { %1116 = vsyncadd (%p1552_p2), [#allocation4], 4294967168  ;;  %s1553_s11 = sadd.s32 4294967295, %s1143_s20   ;;  %s252_s23 = sand.u32 1, %s1127_s16  }
  0x67   : > { %s250_s22 = sand.u32 1, %s1553_s11   ;;  %s1356_s25 = sshll.u32 %s252_s23, 3 }
  0x68   : > { %s251_s24 = scalar_lea.sflag [#allocation6], %s250_s22  ;;  %s254_s8 = scalar_lea.vmem [#allocation5], %s1356_s25 }
  0x69   : > { %p1554_p5 = scmp.ne.s32.totalorder %s1548_s13, 0 }
  0x6b   : > { %1118 = dma.done.wait (%p1554_p5), %s251_s24, 16512  }
  0x6c   : > { %1120 = vsyncadd (%p1554_p5), %s251_s24, 4294950784  ;;  %s780_s12 = sshll.u32 %s252_s23, 10  ;;  %p299_p13 = scmp.lt.s32.totalorder %s1135_s18, 1 }
  0x6d   : > { %s1375_s10 = scalar_lea.vmem [#allocation7], %s780_s12  ;;  %p783_p3 = scmp.ne.s32.totalorder %s1135_s18, 0 }
  0x6e   : > { %s300_s5 = scalar_select %p299_p13, %s1135_s18, 1 }
  0x6f   : > { %313 = sbr.rel (%p783_p3) target bundleno = 118 (0x76), region = 52  ;;  %v314_v0 = vld [vmem:[#allocation3] sm:$0xff] (!%p783_p3) }
  0x70   : > { %s781_s26 = sshll.u32 %s300_s5, 2  ;;  %s782_s28 = sshll.u32 %s300_s5, 3  ;;  %315 = vst [vmem:[#allocation2] sm:$0xff] (!%p783_p3), %v314_v0 }
  0x71   : > { %s1368_s9 = scalar_lea.vmem %s1539_s3, %s781_s26  ;;  %s1373_s6 = scalar_lea.vmem %s1540_s4, %s782_s28 }
  0x76 PF: > { %v321_v1 = vld [vmem:[%s1375_s10 + $0x8] sm:$0xff]  ;;  %v320_v3 = vld [vmem:[%s1375_s10] sm:$0xff]  ;;  %v323_v22 = vld [vmem:[%s1375_s10 + $0x18] sm:$0xff]  ;;  %s631_s13 = sadd.s32 1, %s1135_s18 }
  0x77   : > { %v325_v2 = vld [vmem:[%s1375_s10 + $0x28] sm:$0xff]  ;;  %v324_v5 = vld [vmem:[%s1375_s10 + $0x20] sm:$0xff]  ;;  %v327_v26 = vld [vmem:[%s1375_s10 + $0x38] sm:$0xff]  ;;  %p786_p11 = scmp.ge.s32.totalorder %s631_s13, 2 }
  0x78   : > { %v790_v4 = vpack.c.bf16 %v325_v2, %v321_v1  ;;  %v329_v6 = vld [vmem:[%s1375_s10 + $0x48] sm:$0xff]  ;;  %v792_v8 = vpack.c.bf16 %v324_v5, %v320_v3  ;;  %v328_v10 = vld [vmem:[%s1375_s10 + $0x40] sm:$0xff]  ;;  %v854_v28 = vpack.c.bf16 %v327_v26, %v323_v22  ;;  %v322_v29 = vld [vmem:[%s1375_s10 + $0x10] sm:$0xff] }
  0x79   : > { %v333_v7 = vld [vmem:[%s1375_s10 + $0x68] sm:$0xff]  ;;  %v332_v11 = vld [vmem:[%s1375_s10 + $0x60] sm:$0xff]  ;;  %v326_v30 = vld [vmem:[%s1375_s10 + $0x30] sm:$0xff] }
  0x7a   : > { %v794_v9 = vpack.c.bf16 %v333_v7, %v329_v6  ;;  %v337_v12 = vld [vmem:[%s1375_s10 + $0x88] sm:$0xff]  ;;  %791 = vmatprep.subr.bf16.mxu0 %v790_v4  ;;  %v796_v14 = vpack.c.bf16 %v332_v11, %v328_v10  ;;  %v336_v16 = vld [vmem:[%s1375_s10 + $0x80] sm:$0xff]  ;;  %v856_v31 = vpack.c.bf16 %v326_v30, %v322_v29  ;;  %v331_v32 = vld [vmem:[%s1375_s10 + $0x58] sm:$0xff]  ;;  %855 = vmatprep.subr.bf16.mxu1 %v854_v28 }
  0x7b   : > { %v341_v13 = vld [vmem:[%s1375_s10 + $0xa8] sm:$0xff]  ;;  %793 = vmatpush1.bf16.msra.mxu0 %v792_v8  ;;  %v340_v17 = vld [vmem:[%s1375_s10 + $0xa0] sm:$0xff]  ;;  %v335_v33 = vld [vmem:[%s1375_s10 + $0x78] sm:$0xff] }
  0x7c   : > { %795 = vmatprep.subr.bf16.mxu0 %v794_v9  ;;  %v798_v15 = vpack.c.bf16 %v341_v13, %v337_v12  ;;  %v345_v18 = vld [vmem:[%s1375_s10 + $0xc8] sm:$0xff]  ;;  %v800_v20 = vpack.c.bf16 %v340_v17, %v336_v16  ;;  %v344_v21 = vld [vmem:[%s1375_s10 + $0xc0] sm:$0xff]  ;;  %v858_v36 = vpack.c.bf16 %v335_v33, %v331_v32  ;;  %v330_v37 = vld [vmem:[%s1375_s10 + $0x50] sm:$0xff]  ;;  %857 = vmatpush1.bf16.msra.mxu1 %v856_v31 }
  0x7d   : > { %v349_v19 = vld [vmem:[%s1375_s10 + $0xe8] sm:$0xff]  ;;  %v348_v24 = vld [vmem:[%s1375_s10 + $0xe0] sm:$0xff]  ;;  %v334_v41 = vld [vmem:[%s1375_s10 + $0x70] sm:$0xff] }
  0x7e   : > { %v802_v23 = vpack.c.bf16 %v349_v19, %v345_v18  ;;  %v353_v25 = vld [vmem:[%s1375_s10 + $0x108] sm:$0xff]  ;;  %v804_v34 = vpack.c.bf16 %v348_v24, %v344_v21  ;;  %v352_v35 = vld [vmem:[%s1375_s10 + $0x100] sm:$0xff]  ;;  %859 = vmatprep.subr.bf16.mxu1 %v858_v36  ;;  %v860_v43 = vpack.c.bf16 %v334_v41, %v330_v37  ;;  %v339_v44 = vld [vmem:[%s1375_s10 + $0x98] sm:$0xff] }
  0x7f   : > { %797 = vmatpush1.bf16.msra.mxu0 %v796_v14  ;;  %v357_v27 = vld [vmem:[%s1375_s10 + $0x128] sm:$0xff]  ;;  %v356_v39 = vld [vmem:[%s1375_s10 + $0x120] sm:$0xff]  ;;  %v343_v45 = vld [vmem:[%s1375_s10 + $0xb8] sm:$0xff] }
  0x80   : > { %799 = vmatprep.subr.bf16.mxu0 %v798_v15  ;;  %v806_v38 = vpack.c.bf16 %v357_v27, %v353_v25  ;;  %v361_v40 = vld [vmem:[%s1375_s10 + $0x148] sm:$0xff]  ;;  %v862_v46 = vpack.c.bf16 %v343_v45, %v339_v44  ;;  %v338_v47 = vld [vmem:[%s1375_s10 + $0x90] sm:$0xff]  ;;  %v808_v49 = vpack.c.bf16 %v356_v39, %v352_v35  ;;  %v360_v50 = vld [vmem:[%s1375_s10 + $0x140] sm:$0xff]  ;;  %861 = vmatpush1.bf16.msra.mxu1 %v860_v43 }
  0x81   : > { %v365_v42 = vld [vmem:[%s1375_s10 + $0x168] sm:$0xff]  ;;  %v342_v48 = vld [vmem:[%s1375_s10 + $0xb0] sm:$0xff]  ;;  %v347_v51 = vld [vmem:[%s1375_s10 + $0xd8] sm:$0xff] }
  0x82   : > { %v810_v52 = vpack.c.bf16 %v365_v42, %v361_v40  ;;  %v364_v53 = vld [vmem:[%s1375_s10 + $0x160] sm:$0xff]  ;;  %v369_v54 = vld [vmem:[%s1375_s10 + $0x188] sm:$0xff]  ;;  %v864_v55 = vpack.c.bf16 %v342_v48, %v338_v47  ;;  %v351_v56 = vld [vmem:[%s1375_s10 + $0xf8] sm:$0xff]  ;;  %863 = vmatprep.subr.bf16.mxu1 %v862_v46 }
  0x83   : > { %801 = vmatpush1.bf16.msra.mxu0 %v800_v20  ;;  %v373_v57 = vld [vmem:[%s1375_s10 + $0x1a8] sm:$0xff]  ;;  %v866_v58 = vpack.c.bf16 %v351_v56, %v347_v51  ;;  %v346_v59 = vld [vmem:[%s1375_s10 + $0xd0] sm:$0xff]  ;;  %v355_v61 = vld [vmem:[%s1375_s10 + $0x118] sm:$0xff]  ;;  %v812_v63 = vpack.c.bf16 %v364_v53, %v360_v50 }
  0x84   : > { %803 = vmatprep.subr.bf16.mxu0 %v802_v23  ;;  %v350_v60 = vld [vmem:[%s1375_s10 + $0xf0] sm:$0xff]  ;;  %v359_v62 = vld [vmem:[%s1375_s10 + $0x138] sm:$0xff]  ;;  %v814_v0 = vpack.c.bf16 %v373_v57, %v369_v54  ;;  %v368_v1 = vld [vmem:[%s1375_s10 + $0x180] sm:$0xff]  ;;  %865 = vmatpush1.bf16.msra.mxu1 %v864_v55 }
  0x85   : > { %v372_v2 = vld [vmem:[%s1375_s10 + $0x1a0] sm:$0xff]  ;;  %v377_v3 = vld [vmem:[%s1375_s10 + $0x1c8] sm:$0xff]  ;;  %v868_v4 = vpack.c.bf16 %v350_v60, %v346_v59  ;;  %867 = vmatprep.subr.bf16.mxu1 %v866_v58  ;;  %v870_v6 = vpack.c.bf16 %v359_v62, %v355_v61  ;;  %v354_v7 = vld [vmem:[%s1375_s10 + $0x110] sm:$0xff] }
  0x86   : > { %v381_v5 = vld [vmem:[%s1375_s10 + $0x1e8] sm:$0xff]  ;;  %v358_v8 = vld [vmem:[%s1375_s10 + $0x130] sm:$0xff]  ;;  %v363_v9 = vld [vmem:[%s1375_s10 + $0x158] sm:$0xff]  ;;  %v816_v11 = vpack.c.bf16 %v372_v2, %v368_v1 }
  0x87   : > { %805 = vmatpush1.bf16.msra.mxu0 %v804_v34  ;;  %v367_v10 = vld [vmem:[%s1375_s10 + $0x178] sm:$0xff]  ;;  %v818_v12 = vpack.c.bf16 %v381_v5, %v377_v3  ;;  %v376_v13 = vld [vmem:[%s1375_s10 + $0x1c0] sm:$0xff]  ;;  %v385_v15 = vld [vmem:[%s1375_s10 + $0x208] sm:$0xff]  ;;  %v872_v16 = vpack.c.bf16 %v358_v8, %v354_v7 }
  0x88   : > { %807 = vmatprep.subr.bf16.mxu0 %v806_v38  ;;  %v380_v14 = vld [vmem:[%s1375_s10 + $0x1e0] sm:$0xff]  ;;  %869 = vmatpush1.bf16.msra.mxu1 %v868_v4  ;;  %v389_v17 = vld [vmem:[%s1375_s10 + $0x228] sm:$0xff]  ;;  %v874_v18 = vpack.c.bf16 %v367_v10, %v363_v9  ;;  %v362_v19 = vld [vmem:[%s1375_s10 + $0x150] sm:$0xff] }
  0x89   : > { %871 = vmatprep.subr.bf16.mxu1 %v870_v6  ;;  %v366_v20 = vld [vmem:[%s1375_s10 + $0x170] sm:$0xff]  ;;  %v371_v21 = vld [vmem:[%s1375_s10 + $0x198] sm:$0xff]  ;;  %v820_v23 = vpack.c.bf16 %v380_v14, %v376_v13  ;;  %v822_v24 = vpack.c.bf16 %v389_v17, %v385_v15  ;;  %v384_v25 = vld [vmem:[%s1375_s10 + $0x200] sm:$0xff] }
  0x8a   : > { %v375_v22 = vld [vmem:[%s1375_s10 + $0x1b8] sm:$0xff]  ;;  %v388_v26 = vld [vmem:[%s1375_s10 + $0x220] sm:$0xff]  ;;  %v393_v27 = vld [vmem:[%s1375_s10 + $0x248] sm:$0xff]  ;;  %v876_v28 = vpack.c.bf16 %v366_v20, %v362_v19 }
  0x8b   : > { %809 = vmatpush1.bf16.msra.mxu0 %v808_v49  ;;  %v397_v29 = vld [vmem:[%s1375_s10 + $0x268] sm:$0xff]  ;;  %v878_v30 = vpack.c.bf16 %v375_v22, %v371_v21  ;;  %v370_v31 = vld [vmem:[%s1375_s10 + $0x190] sm:$0xff]  ;;  %v379_v33 = vld [vmem:[%s1375_s10 + $0x1d8] sm:$0xff]  ;;  %v824_v35 = vpack.c.bf16 %v388_v26, %v384_v25 }
  0x8c   : > { %811 = vmatprep.subr.bf16.mxu0 %v810_v52  ;;  %873 = vmatpush1.bf16.msra.mxu1 %v872_v16  ;;  %v374_v32 = vld [vmem:[%s1375_s10 + $0x1b0] sm:$0xff]  ;;  %v383_v34 = vld [vmem:[%s1375_s10 + $0x1f8] sm:$0xff]  ;;  %v392_v36 = vld [vmem:[%s1375_s10 + $0x240] sm:$0xff]  ;;  %v826_v37 = vpack.c.bf16 %v397_v29, %v393_v27 }
  0x8d   : > { %875 = vmatprep.subr.bf16.mxu1 %v874_v18  ;;  %v396_v38 = vld [vmem:[%s1375_s10 + $0x260] sm:$0xff]  ;;  %v401_v39 = vld [vmem:[%s1375_s10 + $0x288] sm:$0xff]  ;;  %v880_v41 = vpack.c.bf16 %v374_v32, %v370_v31  ;;  %v882_v42 = vpack.c.bf16 %v383_v34, %v379_v33  ;;  %v378_v43 = vld [vmem:[%s1375_s10 + $0x1d0] sm:$0xff] }
  0x8e   : > { %v405_v40 = vld [vmem:[%s1375_s10 + $0x2a8] sm:$0xff]  ;;  %v382_v44 = vld [vmem:[%s1375_s10 + $0x1f0] sm:$0xff]  ;;  %v387_v46 = vld [vmem:[%s1375_s10 + $0x218] sm:$0xff]  ;;  %v828_v48 = vpack.c.bf16 %v396_v38, %v392_v36 }
  0x8f   : > { %813 = vmatpush1.bf16.msra.mxu0 %v812_v63  ;;  %v1454_v45 = vld [vmem:[%s254_s8] sm:$0xff]  ;;  %v830_v49 = vpack.c.bf16 %v405_v40, %v401_v39  ;;  %v400_v50 = vld [vmem:[%s1375_s10 + $0x280] sm:$0xff]  ;;  %v409_v52 = vld [vmem:[%s1375_s10 + $0x2c8] sm:$0xff]  ;;  %v884_v53 = vpack.c.bf16 %v382_v44, %v378_v43 }
  0x90   : > { %815 = vmatprep.subr.bf16.mxu0 %v814_v0  ;;  %877 = vmatpush1.bf16.msra.mxu1 %v876_v28  ;;  %v391_v47 = vld [vmem:[%s1375_s10 + $0x238] sm:$0xff]  ;;  %v404_v51 = vld [vmem:[%s1375_s10 + $0x2a0] sm:$0xff]  ;;  %v413_v54 = vld [vmem:[%s1375_s10 + $0x2e8] sm:$0xff] }
  0x91   : > { %879 = vmatprep.subr.bf16.mxu1 %v878_v30  ;;  %534 = vmatprep.mubr.f32.mxu0 %v1454_v45  ;;  %v886_v55 = vpack.c.bf16 %v391_v47, %v387_v46  ;;  %v386_v56 = vld [vmem:[%s1375_s10 + $0x210] sm:$0xff]  ;;  %v395_v58 = vld [vmem:[%s1375_s10 + $0x258] sm:$0xff]  ;;  %v832_v60 = vpack.c.bf16 %v404_v51, %v400_v50  ;;  %v834_v61 = vpack.c.bf16 %v413_v54, %v409_v52  ;;  %v408_v62 = vld [vmem:[%s1375_s10 + $0x2c0] sm:$0xff] }
  0x92   : > { %605 = vmatprep.mubr.f32.mxu1 %v1454_v45  ;;  %v390_v57 = vld [vmem:[%s1375_s10 + $0x230] sm:$0xff]  ;;  %v399_v59 = vld [vmem:[%s1375_s10 + $0x278] sm:$0xff]  ;;  %v412_v63 = vld [vmem:[%s1375_s10 + $0x2e0] sm:$0xff] }
  0x93   : > { %817 = vmatpush1.bf16.msra.mxu0 %v816_v11  ;;  %v417_v0 = vld [vmem:[%s1375_s10 + $0x308] sm:$0xff]  ;;  %v888_v1 = vpack.c.bf16 %v390_v57, %v386_v56  ;;  %v890_v3 = vpack.c.bf16 %v399_v59, %v395_v58  ;;  %v394_v4 = vld [vmem:[%s1375_s10 + $0x250] sm:$0xff]  ;;  %v403_v6 = vld [vmem:[%s1375_s10 + $0x298] sm:$0xff]  ;;  %v836_v8 = vpack.c.bf16 %v412_v63, %v408_v62 }
  0x94   : > { %819 = vmatprep.subr.bf16.mxu0 %v818_v12  ;;  %881 = vmatpush1.bf16.msra.mxu1 %v880_v41  ;;  %v421_v2 = vld [vmem:[%s1375_s10 + $0x328] sm:$0xff]  ;;  %v398_v5 = vld [vmem:[%s1375_s10 + $0x270] sm:$0xff]  ;;  %v407_v7 = vld [vmem:[%s1375_s10 + $0x2b8] sm:$0xff] }
  0x95   : > { %883 = vmatprep.subr.bf16.mxu1 %v882_v42  ;;  %v838_v9 = vpack.c.bf16 %v421_v2, %v417_v0  ;;  %v416_v10 = vld [vmem:[%s1375_s10 + $0x300] sm:$0xff]  ;;  %v425_v12 = vld [vmem:[%s1375_s10 + $0x348] sm:$0xff]  ;;  %v892_v13 = vpack.c.bf16 %v398_v5, %v394_v4  ;;  %v894_v15 = vpack.c.bf16 %v407_v7, %v403_v6  ;;  %v402_v16 = vld [vmem:[%s1375_s10 + $0x290] sm:$0xff]  ;;  %v450_v4 = vlaneseq }
  0x96   : > { %v420_v11 = vld [vmem:[%s1375_s10 + $0x320] sm:$0xff]  ;;  %v429_v14 = vld [vmem:[%s1375_s10 + $0x368] sm:$0xff]  ;;  %v406_v17 = vld [vmem:[%s1375_s10 + $0x2b0] sm:$0xff] }
  0x97   : > { %821 = vmatpush1.bf16.msra.mxu0 %v820_v23  ;;  %v411_v18 = vld [vmem:[%s1375_s10 + $0x2d8] sm:$0xff]  ;;  %v840_v20 = vpack.c.bf16 %v420_v11, %v416_v10  ;;  %v842_v21 = vpack.c.bf16 %v429_v14, %v425_v12  ;;  %v424_v22 = vld [vmem:[%s1375_s10 + $0x340] sm:$0xff]  ;;  %v896_v25 = vpack.c.bf16 %v406_v17, %v402_v16  ;;  %v437_v26 = vld [vmem:[%s1375_s10 + $0x3a8] sm:$0xff]  ;;  %v451_v5 = vshrl.u32 %v450_v4, 7 }
  0x98   : > { %823 = vmatprep.subr.bf16.mxu0 %v822_v24  ;;  %885 = vmatpush1.bf16.msra.mxu1 %v884_v53  ;;  %v415_v19 = vld [vmem:[%s1375_s10 + $0x2f8] sm:$0xff]  ;;  %v428_v23 = vld [vmem:[%s1375_s10 + $0x360] sm:$0xff]  ;;  %v433_v24 = vld [vmem:[%s1375_s10 + $0x388] sm:$0xff] }
  0x99   : > { %887 = vmatprep.subr.bf16.mxu1 %v886_v55  ;;  %v898_v27 = vpack.c.bf16 %v415_v19, %v411_v18  ;;  %v410_v28 = vld [vmem:[%s1375_s10 + $0x2d0] sm:$0xff]  ;;  %v419_v30 = vld [vmem:[%s1375_s10 + $0x318] sm:$0xff]  ;;  %v844_v32 = vpack.c.bf16 %v428_v23, %v424_v22  ;;  %v846_v33 = vpack.c.bf16 %v437_v26, %v433_v24  ;;  %v432_v34 = vld [vmem:[%s1375_s10 + $0x380] sm:$0xff]  ;;  %v452_v6 = vsub.s32 0, %v451_v5 }
  0x9a   : > { %v414_v29 = vld [vmem:[%s1375_s10 + $0x2f0] sm:$0xff]  ;;  %v423_v31 = vld [vmem:[%s1375_s10 + $0x338] sm:$0xff]  ;;  %v441_v36 = vld [vmem:[%s1375_s10 + $0x3c8] sm:$0xff]  ;;  %v456_v11 = vsub.s32 1, %v451_v5  ;;  %v460_v22 = vsub.s32 2, %v451_v5 }
  0x9b   : > { %825 = vmatpush1.bf16.msra.mxu0 %v824_v35  ;;  %v436_v35 = vld [vmem:[%s1375_s10 + $0x3a0] sm:$0xff]  ;;  %v445_v38 = vld [vmem:[%s1375_s10 + $0x3e8] sm:$0xff]  ;;  %v902_v39 = vpack.c.bf16 %v423_v31, %v419_v30  ;;  %v418_v40 = vld [vmem:[%s1375_s10 + $0x310] sm:$0xff] }
  0x9c   : > { %827 = vmatprep.subr.bf16.mxu0 %v826_v37  ;;  %889 = vmatpush1.bf16.msra.mxu1 %v888_v1  ;;  %v900_v37 = vpack.c.bf16 %v414_v29, %v410_v28  ;;  %v422_v41 = vld [vmem:[%s1375_s10 + $0x330] sm:$0xff]  ;;  %v427_v42 = vld [vmem:[%s1375_s10 + $0x358] sm:$0xff]  ;;  %v848_v44 = vpack.c.bf16 %v436_v35, %v432_v34  ;;  %v850_v46 = vpack.c.bf16 %v445_v38, %v441_v36  ;;  %v440_v47 = vld [vmem:[%s1375_s10 + $0x3c0] sm:$0xff] }
  0x9d   : > { %891 = vmatprep.subr.bf16.mxu1 %v890_v3  ;;  %v431_v43 = vld [vmem:[%s1375_s10 + $0x378] sm:$0xff]  ;;  %v426_v51 = vld [vmem:[%s1375_s10 + $0x350] sm:$0xff]  ;;  %v448_v7 = vld [vmem:[%s1368_s9] sm:$0xf] }
  0x9e   : > { %v906_v50 = vpack.c.bf16 %v431_v43, %v427_v42  ;;  %v430_v52 = vld [vmem:[%s1375_s10 + $0x370] sm:$0xff]  ;;  %v435_v53 = vld [vmem:[%s1375_s10 + $0x398] sm:$0xff]  ;;  %v457_v14 = vrot.slane %v448_v7, %v456_v11  ;;  %v461_v24 = vrot.slane %v448_v7, %v460_v22 }
  0x9f   : > { %829 = vmatpush1.bf16.msra.mxu0 %v828_v48  ;;  %v444_v48 = vld [vmem:[%s1375_s10 + $0x3e0] sm:$0xff]  ;;  %v439_v54 = vld [vmem:[%s1375_s10 + $0x3b8] sm:$0xff]  ;;  %v908_v56 = vpack.c.bf16 %v430_v52, %v426_v51  ;;  %v434_v58 = vld [vmem:[%s1375_s10 + $0x390] sm:$0xff] }
  0xa0   : > { %831 = vmatprep.subr.bf16.mxu0 %v830_v49  ;;  %893 = vmatpush1.bf16.msra.mxu1 %v892_v13  ;;  %v904_v49 = vpack.c.bf16 %v422_v41, %v418_v40  ;;  %v852_v55 = vpack.c.bf16 %v444_v48, %v440_v47  ;;  %v910_v57 = vpack.c.bf16 %v439_v54, %v435_v53  ;;  %v438_v59 = vld [vmem:[%s1375_s10 + $0x3b0] sm:$0xff]  ;;  %v318_v62 = vld [vmem:[#allocation2] sm:$0xff] }
  0xa1   : > { %895 = vmatprep.subr.bf16.mxu1 %v894_v15  ;;  %v912_v63 = vpack.c.bf16 %v438_v59, %v434_v58  ;;  %v442_v1 = vld [vmem:[%s1375_s10 + $0x3d0] sm:$0xff] }
  0xa2   : > { %v446_v2 = vld [vmem:[%s1375_s10 + $0x3f0] sm:$0xff] }
  0xa3   : > { %833 = vmatpush1.bf16.msra.mxu0 %v832_v60  ;;  %v443_v60 = vld [vmem:[%s1375_s10 + $0x3d8] sm:$0xff]  ;;  %v916_v3 = vpack.c.bf16 %v446_v2, %v442_v1 }
  0xa4   : > { %835 = vmatprep.subr.bf16.mxu0 %v834_v61  ;;  %897 = vmatpush1.bf16.msra.mxu1 %v896_v25  ;;  %v447_v61 = vld [vmem:[%s1375_s10 + $0x3f8] sm:$0xff] }
  0xa5   : > { %899 = vmatprep.subr.bf16.mxu1 %v898_v27  ;;  %v914_v0 = vpack.c.bf16 %v447_v61, %v443_v60 }
  0xa7   : > { %837 = vmatpush1.bf16.msra.mxu0 %v836_v8  ;;  %v453_v8 = vrot.slane %v448_v7, %v452_v6 }
  0xa8   : > { %839 = vmatprep.subr.bf16.mxu0 %v838_v9  ;;  %901 = vmatpush1.bf16.msra.mxu1 %v900_v37 }
  0xa9   : > { %903 = vmatprep.subr.bf16.mxu1 %v902_v39 }
  0xab   : > { %841 = vmatpush1.bf16.msra.mxu0 %v840_v20 }
  0xac   : > { %843 = vmatprep.subr.bf16.mxu0 %v842_v21  ;;  %905 = vmatpush1.bf16.msra.mxu1 %v904_v49  ;;  %v464_v21 = vsub.s32 3, %v451_v5 }
  0xad   : > { %907 = vmatprep.subr.bf16.mxu1 %v906_v50 }
  0xae   : > { %v465_v23 = vrot.slane %v448_v7, %v464_v21 }
  0xaf   : > { %845 = vmatpush1.bf16.msra.mxu0 %v844_v32 }
  0xb0   : > { %847 = vmatprep.subr.bf16.mxu0 %v846_v33  ;;  %909 = vmatpush1.bf16.msra.mxu1 %v908_v56 }
  0xb1   : > { %911 = vmatprep.subr.bf16.mxu1 %v910_v57 }
  0xb3   : > { %849 = vmatpush1.bf16.msra.mxu0 %v848_v44 }
  0xb4   : > { %851 = vmatprep.subr.bf16.mxu0 %v850_v46  ;;  %913 = vmatpush1.bf16.msra.mxu1 %v912_v63 }
  0xb5   : > { %915 = vmatprep.subr.bf16.mxu1 %v914_v0 }
  0xb7   : > { %853 = vmatpush1.bf16.msra.mxu0 %v852_v55 }
  0xb8   : > { %917 = vmatpush1.bf16.msra.mxu1 %v916_v3 }
  0xba   : > { %535 = vmatmul.mubr.f32.vlgmr.msra.gmra.mrb[0].mxu0 %v318_v62 }
  0xbb   : > { %606 = vmatmul.mubr.f32.vlgmr.msra.gmra.mrb[0].mxu1 %v318_v62 }
 0x18d   : > { %v536_v9 = vpop.f32.mrb[0].mxu0 }
 0x18e   : > { %v537_v10 = vadd.f32 %v536_v9, %v453_v8  ;;  %v538_v12 = vpop.f32.mrb[1].mxu0  ;;  %v607_v16 = vpop.f32.mrb[0].mxu1 }
 0x18f   : > { %v539_v15 = vadd.f32 %v538_v12, %v457_v14  ;;  %v609_v17 = vpop.f32.mrb[1].mxu1  ;;  %v608_v28 = vadd.f32 %v607_v16, %v461_v24 }
 0x190   : > { %v784_v13 = vmul.f32 -1.442695, %v537_v10  ;;  %v610_v25 = vadd.f32 %v609_v17, %v465_v23 }
 0x191   : > { %v785_v18 = vmul.f32 -1.442695, %v539_v15 }
 0x192   : > { %991 = vpow2.f32 %v784_v13 }
 0x193   : > { %993 = vpow2.f32 %v785_v18 }
 0x19c   : > { %v992_v19 = vpop.eup %991 }
 0x19d   : > { %v615_v20 = vadd.f32 1.0, %v992_v19  ;;  %v994_v26 = vpop.eup %993 }
 0x19e   : > { %v621_v30 = vadd.f32 1.0, %v994_v26 }
 0x19f   : > { %995 = vrcp.f32 %v615_v20 }
 0x1a9   : > { %v996_v27 = vpop.eup %995 }
 0x1aa   : > { %v624_v29 = vmul.f32 %v996_v27, %v610_v25 }
 0x1ac   : > { %v625_v31 = vadd.f32 %v624_v29, %v608_v28 }
 0x1ae   : > { %997 = vtanh.f32 %v625_v31 }
 0x1af   : > { %999 = vrcp.f32 %v621_v30 }
 0x1b8   : > { %v998_v32 = vpop.eup %997 }
 0x1b9   : > { %v627_v33 = vsub.f32 %v1454_v45, %v998_v32  ;;  %v1000_v34 = vpop.eup %999  ;;  %635 = sbr.rel (%p786_p11) target bundleno = 448 (0x1c0), region = 56 }
 0x1bb   : > { %v628_v35 = vmul.f32 %v1000_v34, %v627_v33 }
 0x1bd   : > { %v629_v36 = vadd.f32 %v998_v32, %v628_v35 }
 0x1bf   : > { %630 = vst [vmem:[%s1373_s6] sm:$0xff] %v629_v36  ;;  %636 = vst [vmem:[#allocation2] sm:$0xff] (!%p786_p11), %v629_v36 }
 0x1c0 PF: > { %s18_s20 = sadd.s32 1, %s1143_s20   ;;  %s1555_s15 = smov %s1127_s16 }
 0x1c1   : > { %p15_p1 = scmp.ge.s32.totalorder %s18_s20, 4   ;;  %s1556_s16 = smov %s1131_s17 }
 0x1c2   : > { %s1557_s17 = smov %s1219_s27  ;;  %s1558_s18 = smov %s1139_s19 }
 0x1c3   : > { %s1559_s19 = smov %s1561_s21  ;;  %17 = sbr.rel (!%p15_p1) target bundleno = 5 (0x5), region = 104 }
 0x1ca   :  { %662 = vsyncpa [#allocation4], 1 }
 0x1cb   :  { %664 = vsyncpa [#allocation4 + $0x1], 1 }
 0x1cc   :  { %665 = vsyncpa [#allocation6], 1 }
 0x1cd   :  { %667 = vsyncpa [#allocation6 + $0x1], 1 }

</bundles_post_ra>
